<compile_context>
chip_gen: v6e
topology: v6e:2x2x1
jax: 0.10.0
libtpu: 0.0.40
codegen_flags: <defaults>
</compile_context>

<pallas_src>
import jax
import jax.numpy as jnp
from jax import lax
from jax.experimental import pallas as pl
from jax.experimental.pallas import tpu as pltpu

EPS = 1e-5        # torch.nn.LayerNorm default
SUB_ROWS = 128    # in-kernel sub-block size (vreg-pressure bound)


def _round_up(x, n):
    return ((x + n - 1) // n) * n


# ---------------------------------------------------------------------------
# Kernel
# ---------------------------------------------------------------------------

def _ffn_block(x, g, b, w1, b1, w2, b2):
    """LayerNorm -> Linear -> ReLU -> Linear on one row sub-block (f32 math,
    bf16 MXU operands with f32 accumulation)."""
    x = x.astype(jnp.float32)
    mu = jnp.mean(x, axis=-1, keepdims=True)
    xc = x - mu
    var = jnp.mean(xc * xc, axis=-1, keepdims=True)
    xn = (xc * lax.rsqrt(var + EPS)) * g + b
    h = jnp.dot(xn.astype(jnp.bfloat16), w1, preferred_element_type=jnp.float32)
    h = jnp.maximum(h + b1, 0.0)
    y = jnp.dot(h.astype(jnp.bfloat16), w2, preferred_element_type=jnp.float32)
    return y + b2


def _run_tile(m_ref, mask_ref, g_ref, b_ref, w1_ref, b1_ref, w2_ref, b2_ref, o_ref):
    # Hoist the grid-invariant parameter loads out of the sub-block loop.
    g, b = g_ref[...], b_ref[...]
    w1, b1 = w1_ref[...], b1_ref[...]
    w2, b2 = w2_ref[...], b2_ref[...]

    tr = m_ref.shape[0]
    sub = min(tr, SUB_ROWS)
    nsub = tr // sub  # tr is guaranteed to be a multiple of sub (see wrapper)

    def process(r0):
        y = _ffn_block(m_ref[pl.ds(r0, sub), :], g, b, w1, b1, w2, b2)
        if mask_ref is not None:
            y = y * mask_ref[pl.ds(r0, sub), :]
        o_ref[pl.ds(r0, sub), :] = y.astype(o_ref.dtype)

    if nsub == 1:
        process(0)
    else:
        def body(i, carry):
            process(pl.multiple_of(i * sub, sub))
            return carry
        lax.fori_loop(0, nsub, body, 0, unroll=True)


def _kernel_masked(m_ref, mask_ref, g_ref, b_ref, w1_ref, b1_ref, w2_ref, b2_ref, o_ref):
    _run_tile(m_ref, mask_ref, g_ref, b_ref, w1_ref, b1_ref, w2_ref, b2_ref, o_ref)


def _kernel_nomask(m_ref, g_ref, b_ref, w1_ref, b1_ref, w2_ref, b2_ref, o_ref):
    _run_tile(m_ref, None, g_ref, b_ref, w1_ref, b1_ref, w2_ref, b2_ref, o_ref)


# ---------------------------------------------------------------------------
# Wrapper
# ---------------------------------------------------------------------------

def prepare_params(params):
    """One-time parameter prep (reshape + bf16 cast of weight matrices)."""
    c_in = params["ln_gamma"].shape[-1]
    c_hidden = params["w1"].shape[-1]
    c_out = params["w2"].shape[-1]
    return {
        "ln_gamma": params["ln_gamma"].reshape(1, c_in).astype(jnp.float32),
        "ln_beta": params["ln_beta"].reshape(1, c_in).astype(jnp.float32),
        "w1": params["w1"].astype(jnp.bfloat16),
        "b1": params["b1"].reshape(1, c_hidden).astype(jnp.float32),
        "w2": params["w2"].astype(jnp.bfloat16),
        "b2": params["b2"].reshape(1, c_out).astype(jnp.float32),
    }


def _pick_tile_rows(rows, c_in, c_hidden, c_out, in_item, out_item, cap):
    # Streaming tiles are double-buffered; weights are fetched once but the
    # pipeline still allocates two buffers for them.
    w_bytes = 2 * 2 * (c_in * c_hidden + c_hidden * c_out)
    row_bytes = 2 * c_in * in_item + 2 * c_out * out_item + 2 * 4
    budget = max(4 << 20, (40 << 20) - w_bytes)
    tr = min(cap, max(8, (budget // row_bytes) // 8 * 8))
    # Keep >= 2 grid steps so the "parallel" axis can split over v7x's 2 TCs.
    tr = max(8, min(tr, _round_up(pl.cdiv(rows, 2), 8)))
    # Keep tr a multiple of the in-kernel sub-block size.
    if tr > SUB_ROWS:
        tr = _round_up(tr, SUB_ROWS)
    return tr


def input_embedder_forward(m, params, mask=None, *, tile_rows=1024):
    """m: [*, N_res, c_in]; mask: [*, N_res] or None. Returns [*, N_res, c_out].

    `params` may be raw (from init_params) or pre-processed via prepare_params.
    Pass m in bf16 to halve the dominant HBM streams (LN math stays f32).
    """
    if params["ln_gamma"].ndim == 1:  # raw params -> prep on the fly
        params = prepare_params(params)

    *lead, c_in = m.shape
    rows = 1
    for d in lead:
        rows *= d

    c_hidden = params["w1"].shape[1]
    c_out = params["w2"].shape[1]

    in_item = m.dtype.itemsize
    out_item = m.dtype.itemsize
    tr = _pick_tile_rows(rows, c_in, c_hidden, c_out, in_item, out_item, tile_rows)
    grid = (pl.cdiv(rows, tr),)  # partial final block handled by Pallas

    m2 = m.reshape(rows, c_in)

    # VMEM: double-buffered streaming tiles + weights + in-kernel f32 temps.
    sub = min(tr, SUB_ROWS)
    est = (2 * tr * c_in * in_item
           + 2 * tr * c_out * out_item
           + 2 * tr * 4
           + 2 * 2 * (c_in * c_hidden + c_hidden * c_out)
           + 2 * 4 * (2 * c_in + c_hidden + c_out)
           + 4 * sub * (3 * c_in + 2 * c_hidden + 2 * c_out))
    vmem_limit = int(min(48 << 20, max(2 * est, 32 << 20)))

    w_hbm_bytes = 2 * (c_in * c_hidden + c_hidden * c_out)
    cost = pl.CostEstimate(
        flops=2 * rows * (c_in * c_hidden + c_hidden * c_out),
        transcendentals=rows,
        bytes_accessed=(rows * c_in * in_item + rows * c_out * out_item
                        + (rows * 4 if mask is not None else 0) + w_hbm_bytes),
    )

    def full(r, c):
        return pl.BlockSpec((r, c), lambda i: (0, 0))

    weight_specs = [
        full(1, c_in),           # gamma
        full(1, c_in),           # beta
        full(c_in, c_hidden),    # W1
        full(1, c_hidden),       # b1
        full(c_hidden, c_out),   # W2
        full(1, c_out),          # b2
    ]
    row_spec_in = pl.BlockSpec((tr, c_in), lambda i: (i, 0))
    row_spec_out = pl.BlockSpec((tr, c_out), lambda i: (i, 0))

    if mask is None:
        kernel = _kernel_nomask
        in_specs = [row_spec_in] + weight_specs
        operands = (m2, params["ln_gamma"], params["ln_beta"],
                    params["w1"], params["b1"], params["w2"], params["b2"])
    else:
        mask2 = mask.reshape(rows, 1).astype(jnp.float32)
        kernel = _kernel_masked
        in_specs = [row_spec_in, pl.BlockSpec((tr, 1), lambda i: (i, 0))] + weight_specs
        operands = (m2, mask2, params["ln_gamma"], params["ln_beta"],
                    params["w1"], params["b1"], params["w2"], params["b2"])

    out2 = pl.pallas_call(
        kernel,
        out_shape=jax.ShapeDtypeStruct((rows, c_out), m.dtype),
        grid_spec=pltpu.PrefetchScalarGridSpec(
            num_scalar_prefetch=0,
            grid=grid,
            in_specs=in_specs,
            out_specs=row_spec_out,
        ),
        compiler_params=pltpu.CompilerParams(
            dimension_semantics=("parallel",),
            vmem_limit_bytes=vmem_limit,
        ),
        cost_estimate=cost,
    )(*operands)

    return out2.reshape(*lead, c_out)


# ---------------------------------------------------------------------------
# Params / reference / test
# ---------------------------------------------------------------------------

def init_params(key, c_in, c_hidden, c_out):
    # NOTE: OpenFold's Linear(init='relu') is He-normal and init='final' is
    # zero; small random weights keep the test non-trivial (forward-pass
    # semantics are unchanged).
    k1, k2 = jax.random.split(key)
    he = (2.0 / c_in) ** 0.5
    return {
        "ln_gamma": jnp.ones((c_in,), jnp.float32),
        "ln_beta": jnp.zeros((c_in,), jnp.float32),
        "w1": jax.random.normal(k1, (c_in, c_hidden), jnp.float32) * he,
        "b1": jnp.zeros((c_hidden,), jnp.float32),
        "w2": jax.random.normal(k2, (c_hidden, c_out), jnp.float32) * 0.02,
        "b2": jnp.zeros((c_out,), jnp.float32),
    }


def _reference(m, params, mask=None):
    if mask is None:
        mask = jnp.ones(m.shape[:-1], m.dtype)
    mask = mask[..., None]
    mu = jnp.mean(m, axis=-1, keepdims=True)
    var = jnp.mean((m - mu) ** 2, axis=-1, keepdims=True)
    xn = (m - mu) / jnp.sqrt(var + EPS)
    xn = xn * params["ln_gamma"] + params["ln_beta"]
    h = jnp.maximum(xn @ params["w1"] + params["b1"], 0.0)
    return (h @ params["w2"] + params["b2"]) * mask


if __name__ == "__main__":
    key = jax.random.PRNGKey(0)
    kp, km, kmask, km2 = jax.random.split(key, 4)

    c_in, c_hidden, c_out = 32, 64, 32
    params = init_params(kp, c_in, c_hidden, c_out)
    prepped = prepare_params(params)  # one-time weight prep (bf16 cast / reshape)

    # Small shape consistent with the module: [B, N_res, c_in], with a mask.
    B, N_res = 2, 8
    m = jax.random.normal(km, (B, N_res, c_in), jnp.float32)
    mask = (jax.random.uniform(kmask, (B, N_res)) > 0.2).astype(jnp.float32)

    out = jax.block_until_ready(input_embedder_forward(m, prepped, mask))
    ref = _reference(m, params, mask)
    assert out.shape == (B, N_res, c_out)
    assert jnp.allclose(out, ref, atol=2e-2, rtol=2e-2), "masked path mismatch"

    # Second check: mask=None specialization, raw params, partial final block
    # (rows=400 -> tile 256 -> grid of 2, last block partial) and the
    # in-kernel 128-row sub-block loop.
    B2, N2 = 2, 200
    m_big = jax.random.normal(km2, (B2, N2, c_in), jnp.float32)
    out_big = jax.block_until_ready(input_embedder_forward(m_big, params))
    ref_big = _reference(m_big, params)
    assert out_big.shape == (B2, N2, c_out)
    assert jnp.allclose(out_big, ref_big, atol=2e-2, rtol=2e-2), "no-mask path mismatch"

    print("KERNEL_OK")
</pallas_src>

<mosaic_0001>
module attributes {stable_mosaic.version = 11 : i64} {
  func.func @_kernel_masked(%arg0: i32, %arg1: memref<8x32xf32, #tpu.memory_space<vmem>>, %arg2: memref<8x1xf32, #tpu.memory_space<vmem>>, %arg3: memref<1x32xf32, #tpu.memory_space<vmem>>, %arg4: memref<1x32xf32, #tpu.memory_space<vmem>>, %arg5: memref<32x64xbf16, #tpu.memory_space<vmem>>, %arg6: memref<1x64xf32, #tpu.memory_space<vmem>>, %arg7: memref<64x32xbf16, #tpu.memory_space<vmem>>, %arg8: memref<1x32xf32, #tpu.memory_space<vmem>>, %arg9: memref<8x32xf32, #tpu.memory_space<vmem>>) attributes {dimension_semantics = [#tpu.dimension_semantics<parallel>], iteration_bounds = array<i64: 2>, scalar_prefetch = 0 : i64, scratch_operands = 0 : i64, tpu.core_type = #tpu.core_type<tc>, window_params = [{transform_indices = @transform_0, window_bounds = array<i64: 8, 32>}, {transform_indices = @transform_1, window_bounds = array<i64: 8, 1>}, {pipeline_mode = #tpu.pipeline_mode<synchronous>, transform_indices = @transform_2, window_bounds = array<i64: 1, 32>}, {pipeline_mode = #tpu.pipeline_mode<synchronous>, transform_indices = @transform_3, window_bounds = array<i64: 1, 32>}, {pipeline_mode = #tpu.pipeline_mode<synchronous>, transform_indices = @transform_4, window_bounds = array<i64: 32, 64>}, {pipeline_mode = #tpu.pipeline_mode<synchronous>, transform_indices = @transform_5, window_bounds = array<i64: 1, 64>}, {pipeline_mode = #tpu.pipeline_mode<synchronous>, transform_indices = @transform_6, window_bounds = array<i64: 64, 32>}, {pipeline_mode = #tpu.pipeline_mode<synchronous>, transform_indices = @transform_7, window_bounds = array<i64: 1, 32>}, {transform_indices = @transform_8, window_bounds = array<i64: 8, 32>}]} {
    %c0 = arith.constant 0 : index
    %c0_0 = arith.constant 0 : index
    %0 = vector.load %arg3[%c0, %c0_0] : memref<1x32xf32, #tpu.memory_space<vmem>>, vector<1x32xf32>
    %c0_1 = arith.constant 0 : index
    %c0_2 = arith.constant 0 : index
    %1 = vector.load %arg4[%c0_1, %c0_2] : memref<1x32xf32, #tpu.memory_space<vmem>>, vector<1x32xf32>
    %c0_3 = arith.constant 0 : index
    %c0_4 = arith.constant 0 : index
    %2 = vector.load %arg5[%c0_3, %c0_4] : memref<32x64xbf16, #tpu.memory_space<vmem>>, vector<32x64xbf16>
    %c0_5 = arith.constant 0 : index
    %c0_6 = arith.constant 0 : index
    %3 = vector.load %arg6[%c0_5, %c0_6] : memref<1x64xf32, #tpu.memory_space<vmem>>, vector<1x64xf32>
    %c0_7 = arith.constant 0 : index
    %c0_8 = arith.constant 0 : index
    %4 = vector.load %arg7[%c0_7, %c0_8] : memref<64x32xbf16, #tpu.memory_space<vmem>>, vector<64x32xbf16>
    %c0_9 = arith.constant 0 : index
    %c0_10 = arith.constant 0 : index
    %5 = vector.load %arg8[%c0_9, %c0_10] : memref<1x32xf32, #tpu.memory_space<vmem>>, vector<1x32xf32>
    %c0_11 = arith.constant 0 : index
    %c0_12 = arith.constant 0 : index
    %6 = vector.load %arg1[%c0_11, %c0_12] : memref<8x32xf32, #tpu.memory_space<vmem>>, vector<8x32xf32>
    %cst = arith.constant dense<0.000000e+00> : vector<8xf32>
    %7 = vector.multi_reduction <add>, %6, %cst [1] : vector<8x32xf32> to vector<8xf32>
    %8 = vector.shape_cast %7 : vector<8xf32> to vector<8x1xf32>
    %cst_13 = arith.constant 3.200000e+01 : f32
    %9 = vector.broadcast %cst_13 : f32 to vector<8x1xf32>
    %10 = arith.divf %8, %9 : vector<8x1xf32>
    %11 = vector.broadcast %10 : vector<8x1xf32> to vector<8x32xf32>
    %12 = arith.subf %6, %11 : vector<8x32xf32>
    %13 = arith.mulf %12, %12 : vector<8x32xf32>
    %cst_14 = arith.constant dense<0.000000e+00> : vector<8xf32>
    %14 = vector.multi_reduction <add>, %13, %cst_14 [1] : vector<8x32xf32> to vector<8xf32>
    %15 = vector.shape_cast %14 : vector<8xf32> to vector<8x1xf32>
    %cst_15 = arith.constant 3.200000e+01 : f32
    %16 = vector.broadcast %cst_15 : f32 to vector<8x1xf32>
    %17 = arith.divf %15, %16 : vector<8x1xf32>
    %cst_16 = arith.constant 9.99999974E-6 : f32
    %18 = vector.broadcast %cst_16 : f32 to vector<8x1xf32>
    %19 = arith.addf %17, %18 : vector<8x1xf32>
    %20 = math.rsqrt %19 : vector<8x1xf32>
    %21 = vector.broadcast %20 : vector<8x1xf32> to vector<8x32xf32>
    %22 = arith.mulf %12, %21 : vector<8x32xf32>
    %23 = vector.broadcast %0 : vector<1x32xf32> to vector<8x32xf32>
    %24 = arith.mulf %22, %23 : vector<8x32xf32>
    %25 = vector.broadcast %1 : vector<1x32xf32> to vector<8x32xf32>
    %26 = arith.addf %24, %25 : vector<8x32xf32>
    %27 = arith.truncf %26 : vector<8x32xf32> to vector<8x32xbf16>
    %cst_17 = arith.constant dense<0.000000e+00> : vector<8x64xf32>
    %28 = tpu.matmul %27, %2, %cst_17 {dimension_numbers = #tpu.dot_dimension_numbers<[1], [0], [0], [1], [0, 0, 1, 1], [], []>} : vector<8x32xbf16>, vector<32x64xbf16>, vector<8x64xf32> -> vector<8x64xf32>
    %29 = vector.broadcast %3 : vector<1x64xf32> to vector<8x64xf32>
    %30 = arith.addf %28, %29 : vector<8x64xf32>
    %cst_18 = arith.constant 0.000000e+00 : f32
    %31 = vector.broadcast %cst_18 : f32 to vector<8x64xf32>
    %32 = arith.maximumf %30, %31 : vector<8x64xf32>
    %33 = arith.truncf %32 : vector<8x64xf32> to vector<8x64xbf16>
    %cst_19 = arith.constant dense<0.000000e+00> : vector<8x32xf32>
    %34 = tpu.matmul %33, %4, %cst_19 {dimension_numbers = #tpu.dot_dimension_numbers<[1], [0], [0], [1], [0, 0, 1, 1], [], []>} : vector<8x64xbf16>, vector<64x32xbf16>, vector<8x32xf32> -> vector<8x32xf32>
    %35 = vector.broadcast %5 : vector<1x32xf32> to vector<8x32xf32>
    %36 = arith.addf %34, %35 : vector<8x32xf32>
    %c0_20 = arith.constant 0 : index
    %c0_21 = arith.constant 0 : index
    %37 = vector.load %arg2[%c0_20, %c0_21] : memref<8x1xf32, #tpu.memory_space<vmem>>, vector<8x1xf32>
    %38 = vector.broadcast %37 : vector<8x1xf32> to vector<8x32xf32>
    %39 = arith.mulf %36, %38 : vector<8x32xf32>
    %c0_22 = arith.constant 0 : index
    %c0_23 = arith.constant 0 : index
    %40 = vector.load %arg9[%c0_22, %c0_23] : memref<8x32xf32, #tpu.memory_space<vmem>>, vector<8x32xf32>
    tpu.vector_store %arg9[%c0_22, %c0_23], %39 {strides = array<i32>} : memref<8x32xf32, #tpu.memory_space<vmem>>, vector<8x32xf32>,
    return
  }
  func.func @transform_0(%arg0: i32) -> (i32, i32) {
    %c0_i32 = arith.constant 0 : i32
    %c0_i32_0 = arith.constant 0 : i32
    return %arg0, %c0_i32 : i32, i32
  }
  func.func @transform_1(%arg0: i32) -> (i32, i32) {
    %c0_i32 = arith.constant 0 : i32
    %c0_i32_0 = arith.constant 0 : i32
    return %arg0, %c0_i32 : i32, i32
  }
  func.func @transform_2(%arg0: i32) -> (i32, i32) {
    %c0_i32 = arith.constant 0 : i32
    %c0_i32_0 = arith.constant 0 : i32
    %c0_i32_1 = arith.constant 0 : i32
    return %c0_i32, %c0_i32_0 : i32, i32
  }
  func.func @transform_3(%arg0: i32) -> (i32, i32) {
    %c0_i32 = arith.constant 0 : i32
    %c0_i32_0 = arith.constant 0 : i32
    %c0_i32_1 = arith.constant 0 : i32
    return %c0_i32, %c0_i32_0 : i32, i32
  }
  func.func @transform_4(%arg0: i32) -> (i32, i32) {
    %c0_i32 = arith.constant 0 : i32
    %c0_i32_0 = arith.constant 0 : i32
    %c0_i32_1 = arith.constant 0 : i32
    return %c0_i32, %c0_i32_0 : i32, i32
  }
  func.func @transform_5(%arg0: i32) -> (i32, i32) {
    %c0_i32 = arith.constant 0 : i32
    %c0_i32_0 = arith.constant 0 : i32
    %c0_i32_1 = arith.constant 0 : i32
    return %c0_i32, %c0_i32_0 : i32, i32
  }
  func.func @transform_6(%arg0: i32) -> (i32, i32) {
    %c0_i32 = arith.constant 0 : i32
    %c0_i32_0 = arith.constant 0 : i32
    %c0_i32_1 = arith.constant 0 : i32
    return %c0_i32, %c0_i32_0 : i32, i32
  }
  func.func @transform_7(%arg0: i32) -> (i32, i32) {
    %c0_i32 = arith.constant 0 : i32
    %c0_i32_0 = arith.constant 0 : i32
    %c0_i32_1 = arith.constant 0 : i32
    return %c0_i32, %c0_i32_0 : i32, i32
  }
  func.func @transform_8(%arg0: i32) -> (i32, i32) {
    %c0_i32 = arith.constant 0 : i32
    %c0_i32_0 = arith.constant 0 : i32
    return %arg0, %c0_i32 : i32, i32
  }
}

</mosaic_0001>

<bundles_post_ra>
// kernel: tpu_custom_call.1
= control target key start
LH: loop header
LB: loop body
LE: loop exit
PB: predicated region body
PF: predicated region fallthrough
CT: control target
= control target key end

     0   :  { %13 = vsyncpa [#allocation3], 0  ;;  %s953_s0 = inlined_call_operand.vmem [shape: f32[16,32], index: 0, kind: input, shape index: {}]   ;;  %s954_s1 = inlined_call_operand.vmem [shape: f32[16,1], index: 1, kind: input, shape index: {}]   ;;  %s955_s2 = inlined_call_operand.vmem [shape: f32[1,32], index: 2, kind: input, shape index: {}]   ;;  %s956_s3 = inlined_call_operand.vmem [shape: f32[1,32], index: 3, kind: input, shape index: {}]   ;;  %s957_s4 = inlined_call_operand.vmem [shape: bf16[32,64], index: 4, kind: input, shape index: {}]   ;;  %s958_s5 = inlined_call_operand.vmem [shape: f32[1,64], index: 5, kind: input, shape index: {}]   ;;  %s959_s6 = inlined_call_operand.vmem [shape: bf16[64,32], index: 6, kind: input, shape index: {}]   ;;  %s960_s7 = inlined_call_operand.vmem [shape: f32[1,32], index: 7, kind: input, shape index: {}]   ;;  %s961_s8 = inlined_call_operand.hbm [shape: f32[16,32], index: 8, kind: output, shape index: {}]  }
   0x1   :  { %15 = vsyncpa [#allocation3 + $0x1], 0  ;;  %s810_s27 = smov 0   ;;  %s812_s28 = smov 0  }
   0x2   :  { %s814_s29 = smov 0   ;;  %s816_s30 = smov 0  }
   0x3 LB: > { %s831_s9 = sadd.s32 4294967295, %s759_s30   ;;  %s596_s10 = sadd.s32 4294967294, %s759_s30   ;;  %s759_s30 = sphi %s816_s30, %s967_s30   ;;  %s755_s29 = sphi %s814_s29, %s966_s29   ;;  %s751_s28 = sphi %s812_s28, %s965_s28   ;;  %s747_s27 = sphi %s810_s27, %s964_s27  }
   0x4   : > { %s835_s11 = sadd.s32 1, %s759_s30   ;;  %s206_s12 = sadd.s32 1, %s755_s29 }
   0x5   : > { %s203_s13 = ssub.s32 %s759_s30, %s835_s11  ;;  %p216_p0 = scmp.ne.s32.totalorder %s755_s29, %s751_s28 }
   0x6   : > { %p204_p1 = scmp.eq.s32.totalorder %s203_s13, 0  ;;  %p217_p2 = scmp.eq.s32.totalorder %s831_s9, 1 }
   0x7   : > { %p222_p3 = scmp.ne.s32.totalorder %s751_s28, %s747_s27  ;;  %p223_p4 = scmp.eq.s32.totalorder %s596_s10, 1 }
   0x8   : > { %s846_s14 = scalar_select %p204_p1, %s755_s29, %s206_s12  }
   0x9   : > { %p848_p5 = por %p217_p2, %p216_p0  ;;  %p852_p6 = por %p223_p4, %p222_p3 }
   0xa   : > { %p599_p7 = scmp.ge.s32.totalorder %s759_s30, 1  ;;  %p273_p8 = scmp.lt.s32.totalorder %s759_s30, 3 }
   0xc   : > { %p274_p9 = pnand %p599_p7, %p273_p8 }
   0xd   : > { %p310_p10 = scmp.lt.s32.totalorder (!%p274_p9), %s831_s9, 1  ;;  %s616_s23 = sshll.u32 (!%p274_p9), %s831_s9, 7 }
   0xe   : > { %277 = sbr.rel (%p274_p9) target bundleno = 744 (0x2e8), region = 52  ;;  %s911_s12 = scalar_lea.hbm (!%p274_p9), %s961_s8, %s616_s23 }
   0xf   : > { %s764_s19 = smov (!%p274_p9), [#allocation2]  }
  0x10   : > { %s703_s20 = sshll.u32 (!%p274_p9), %s764_s19, 4  ;;  %s704_s20 = int_to_ptr.vmem [resolvable:$false] %s703_s20 }
  0x13   : > { %s860_s17 = scalar_select %p310_p10, %s831_s9, 1  ;;  %vm336_vm0 = vcmask 261120   ;;  %v691_v7 = vld [vmem:[%s957_s4 + $0x8] sm:$0xff]   ;;  %v761_v8 = vmov 0.0   ;;  %vm762_vm1 = vmmov 0   ;;  %v692_v9 = vld [vmem:[%s957_s4] sm:$0xff]  }
  0x14   : > { %627 = vmatprep.subr.bf16.mxu0 %v761_v8  ;;  %631 = vmatprep.mubr.msk.bf16.mxu0 %vm762_vm1, %v761_v8  ;;  %v693_v10 = vld [vmem:[%s959_s6 + $0x18] sm:$0xff]   ;;  %v694_v11 = vld [vmem:[%s959_s6 + $0x10] sm:$0xff]   ;;  %v603_v16 = vld [vmem:[%s955_s2] ss:$0 sm:$0xff]  ;;  %v763_v24 = vmov 0   ;;  %vm459_vm2 = vcmask 523264  }
  0x15   : > { %s601_s18 = sshll.u32 %s860_s17, 3  ;;  %628 = vmatpush3.bf16.msra.mxu0 %v691_v7  ;;  %635 = vmatprep.subr.bf16.mxu1 %v761_v8  ;;  %v604_v18 = vld [vmem:[%s956_s3] ss:$0 sm:$0xff]  ;;  %v695_v22 = vld [vmem:[%s959_s6 + $0x8] sm:$0xff]   ;;  %s307_s17 = sand.u32 1, %s751_s28  }
  0x16   : > { %s313_s21 = scalar_lea.vmem %s953_s0, %s601_s18  ;;  %629 = vmatprep.subr.bf16.mxu0 %v761_v8  ;;  %643 = vmatprep.mubr.msk.bf16.mxu1 %vm762_vm1, %v761_v8  ;;  %v696_v23 = vld [vmem:[%s959_s6] sm:$0xff]   ;;  %s317_s13 = scalar_lea.vmem %s954_s1, %s601_s18 }
  0x17   : > { %v335_v0 = vld [vmem:[%s313_s21] sm:$0xff]  ;;  %636 = vmatpush3.bf16.msra.mxu1 %v693_v10  ;;  %689 = vset.pattern.permute.xlu1 %v763_v24  ;;  %s600_s18 = sshll.u32 %s307_s17, 3  ;;  %s512_s9 = scalar_lea.sflag [#allocation3], %s307_s17 }
  0x18   : > { %v337_v1 = vsel %vm336_vm0, %v335_v0, 0.0  ;;  %637 = vmatprep.subr.bf16.mxu1 %v761_v8  ;;  %v503_v25 = vld [vmem:[%s317_s13] sm:$0xff]  ;;  %690 = vset.pattern.permute.xlu0 %v763_v24  ;;  %s309_s24 = scalar_lea.vmem [#allocation2], %s600_s18  ;;  %s705_s18 = scalar_lea.vmem %s704_s20, 256 }
  0x19   : > { %338 = vadd.xlane.f32.xlu0 %v337_v1  ;;  %630 = vmatpush3.bf16.msra.mxu0 %v692_v9  ;;  %v605_v26 = vld [vmem:[%s958_s5] ss:$0 sm:$0xff]  ;;  %s525_s25 = sshll.u32 %s309_s24, 4  ;;  %s913_s25 = int_to_ptr.vmem [resolvable:$true] %s525_s25 }
  0x1a   : > { %506 = vperm.xlu1 %689, %v503_v25   ;;  %v609_v34 = vld [vmem:[%s960_s7] ss:$0 sm:$0xff]  ;;  %s699_s13 = scalar_lea.vmem %s913_s25, 128  ;;  %p706_p0 = scmp.lt.s32.totalorder %s913_s25, %s704_s20 }
  0x1b   : > { %638 = vmatpush3.bf16.msra.mxu1 %v694_v11  ;;  %p700_p11 = scmp.ne.s32.totalorder %s913_s25, %s699_s13  ;;  %p707_p1 = scmp.lt.s32.totalorder %s705_s18, %s699_s13 }
  0x1c   : > { %639 = vmatprep.subr.bf16.mxu1 %v761_v8 }
  0x1d   : > { %p701_p12 = pnand %p700_p11, %p848_p5  ;;  %p708_p2 = por %p707_p1, %p706_p0 }
  0x1f   : > { %640 = vmatpush3.bf16.msra.mxu1 %v695_v22  ;;  %p702_p13 = pneg %p701_p12 }
  0x20   : > { %641 = vmatprep.subr.bf16.mxu1 %v761_v8 }
  0x21   : > { %p709_p3 = pnand %p708_p2, %p702_p13 }
  0x23   : > { %642 = vmatpush3.bf16.msra.mxu1 %v696_v23 }
  0x95   : > { %v507_v36 = vpop.permute.xlu1 %506 }
  0xa2   : > { %v339_v2 = vpop.xlane.xlu0 %338 }
  0xa3   : > { %v341_v3 = vmul.f32 0.03125, %v339_v2 }
  0xa5   : > { %v342_v4 = vsub.f32 %v335_v0, %v341_v3 }
  0xa7   : > { %v343_v5 = vmul.f32 %v342_v4, %v342_v4 }
  0xa9   : > { %v344_v6 = vsel %vm336_vm0, %v343_v5, 0.0 }
  0xaa   : > { %345 = vadd.xlane.f32.xlu0 %v344_v6 }
 0x133   : > { %v346_v12 = vpop.xlane.xlu0 %345 }
 0x134   : > { %v347_v13 = vmul.f32 0.03125, %v346_v12 }
 0x136   : > { %v348_v14 = vadd.f32 1e-05, %v347_v13 }
 0x138   : > { %697 = vrsqrt.f32 %v348_v14 }
 0x145   : > { %v698_v15 = vpop.eup %697 }
 0x146   : > { %v350_v17 = vmul.f32 %v698_v15, %v342_v4 }
 0x148   : > { %v357_v19 = vmul.f32 %v603_v16, %v350_v17 }
 0x14a   : > { %v364_v20 = vadd.f32 %v604_v18, %v357_v19 }
 0x14c   : > { %v365_v21 = vpack.c.bf16 %v364_v20, %v364_v20 }
 0x14e   : > { %632 = vmatmul.mubr.msk.bf16.vlgmr.msra.gmra.mxu0 %vm336_vm0, %v365_v21 }
 0x20e   : > { %v421_v27 = vpop.f32.mrf.mxu0 }
 0x20f   : > { %v422_v28 = vadd.f32 %v605_v26, %v421_v27 }
 0x210   : > { %v633_v29 = vpop.f32.mrf.mxu0 }
 0x211   : > { %v427_v30 = vmax.f32 %v422_v28, 0.0 }
 0x212   : > { %v424_v31 = vpop.f32.mrf.mxu0 }
 0x213   : > { %v428_v32 = vpack.c.bf16 %v427_v30, %v427_v30 }
 0x214   : > { %v634_v33 = vpop.f32.mrf.mxu0 }
 0x215   : > { %644 = vmatmul.mubr.msk.bf16.vlgmr.msra.gmra.mxu1 %vm459_vm2, %v428_v32 }
 0x2d5   : > { %v497_v35 = vpop.f32.mrf.mxu1 }
 0x2d6   : > { %v498_v37 = vadd.f32 %v609_v34, %v497_v35 }
 0x2d7   : > { %v645_v38 = vpop.f32.mrf.mxu1 }
 0x2d8   : > { %v509_v39 = vmul.f32 %v507_v36, %v498_v37 }
 0x2d9   : > { %v500_v40 = vpop.f32.mrf.mxu1 }
 0x2da   : > { %510 = vst.msk [vmem:[%s309_s24] sm:$0xff] %vm336_vm0, %v509_v39 }
 0x2db   : > { %v646_v41 = vpop.f32.mrf.mxu1 }
 0x2dc   : > { %712 = shalt.err (!%p709_p3)
}
 0x2dd   : > { %s713_s21 = scalar_lea.hbm %s911_s12, 128  ;;  %s717_s23 = scalar_lea.hbm %s961_s8, 256 }
 0x2de   : > { %p714_p4 = scmp.ne.s32.totalorder %s911_s12, %s713_s21  ;;  %p718_p9 = scmp.lt.s32.totalorder %s911_s12, %s961_s8 }
 0x2df   : > { %p719_p10 = scmp.lt.s32.totalorder %s717_s23, %s713_s21 }
 0x2e0   : > { %p715_p7 = pnand %p714_p4, %p848_p5 }
 0x2e1   : > { %p720_p11 = por %p719_p10, %p718_p9 }
 0x2e2   : > { %p716_p8 = pneg %p715_p7 }
 0x2e4   : > { %p721_p12 = pnand %p720_p11, %p716_p8 }
 0x2e6   : > { %724 = shalt.err (!%p721_p12)
}
 0x2e7   : > { %647 = dma.vmem_to_hbm [thread:$0]  (%p848_p5), %s913_s25, 128, %s911_s12, %s512_s9  }
 0x2e8 PF: > { %p653_p13 = scmp.ge.s32.totalorder %s759_s30, 2  ;;  %s537_s10 = sand.u32 1, %s747_s27  }
 0x2e9   : > { %s538_s13 = scalar_lea.sflag [#allocation3], %s537_s10 }
 0x2ea   : > { %p650_p0 = pnand %p653_p13, %p852_p6 }
 0x2ec   : > { %p651_p1 = pneg %p650_p0 }
 0x2ee   : > { %742 = dma.done.wait (%p651_p1), %s538_s13, 128  }
 0x2ef   : > { %744 = vsyncadd (%p651_p1), %s538_s13, 4294967168  ;;  %p18_p2 = scmp.ge.s32.totalorder %s835_s11, 4   ;;  %s964_s27 = smov %s751_s28 }
 0x2f0   : > { %s965_s28 = smov %s755_s29  ;;  %s966_s29 = smov %s846_s14 }
 0x2f1   : > { %s967_s30 = smov %s835_s11  ;;  %20 = sbr.rel (!%p18_p2) target bundleno = 3 (0x3), region = 90 }
 0x2f6   :  { %543 = vsyncpa [#allocation3], 1 }
 0x2f7   :  { %545 = vsyncpa [#allocation3 + $0x1], 1 }

</bundles_post_ra>
